<compile_context>
chip_gen: v6e
topology: v6e:2x2x1
jax: 0.10.0
libtpu: 0.0.40
codegen_flags: <defaults>
</compile_context>

<pallas_src>
import jax
import jax.numpy as jnp
from jax import lax
from jax.experimental import pallas as pl
from jax.experimental.pallas import tpu as pltpu


def _fctk_proj_kernel(x_ref, wq_ref, wkv_ref, wk_ref, wv_ref,
                      q_ref, k_ref, v_ref, lat_ref):
    """One (row-tile i, out-column-tile j) step of the projection chain.

    All weights arrive in torch (out_features, in_features) layout, so every
    projection is a transposed-RHS contraction handled directly by the MXU.
    """
    j = pl.program_id(1)
    x = x_ref[...]

    # dimension_numbers for  y = a @ w.T  with w in (out, in) layout.
    dn = (((1,), (1,)), ((), ()))

    # kv_latent is shared by every output-column tile of this row tile:
    # compute it once per row tile and keep the f32 accumulator in scratch.
    @pl.when(j == 0)
    def _():
        lat_ref[...] = lax.dot_general(
            x, wkv_ref[...], dimension_numbers=dn,
            preferred_element_type=jnp.float32)

    # query tile: x @ Wq[j-cols].T
    q_ref[...] = lax.dot_general(
        x, wq_ref[...], dimension_numbers=dn,
        preferred_element_type=jnp.float32).astype(q_ref.dtype)

    lat = lat_ref[...]
    if wk_ref.dtype != jnp.float32:
        # One small VPU cast per (i, j); keeps the stored latent in f32.
        lat = lat.astype(wk_ref.dtype)

    k_ref[...] = lax.dot_general(
        lat, wk_ref[...], dimension_numbers=dn,
        preferred_element_type=jnp.float32).astype(k_ref.dtype)

    v_ref[...] = lax.dot_general(
        lat, wv_ref[...], dimension_numbers=dn,
        preferred_element_type=jnp.float32).astype(v_ref.dtype)

    # TODO(synk): the reference forward() truncates right after the value
    # projection; flex_attention with the SWA/top-k block masks, forgetting,
    # and out_proj are never reached in the given code, so they are
    # intentionally not implemented here.


def fctk_forward_projections(x, wq, wkv, wk, wv, *, tm=256, tn=512,
                             vmem_limit_bytes=48 * 1024 * 1024):
    """Runs the kv_cache=None branch of ForgetfulCausalTopKAttention.forward.

    Args:
      x:   (B, S, H) input (f32 or bf16).
      wq:  (H, H)  torch-layout query_proj.weight     (out, in)
      wkv: (L, H)  torch-layout kv_latent_proj.weight (out, in)
      wk:  (H, L)  torch-layout k_proj.weight         (out, in)
      wv:  (H, L)  torch-layout v_proj.weight         (out, in)
      tm:  row tile (rows of the flattened (B*S, H) view). 256-512 is a good
           range on v5e; larger is fine on v6e/v7x. Choose tm so (B*S)/tm is
           an even count on v7x to balance its two TensorCores.
      tn:  output-feature tile (columns of Wq/Wk/Wv).

    Returns:
      (query, key, value), each (B, S, H) in x.dtype.
    """
    B, S, H = x.shape
    L, H_in = wkv.shape
    assert H_in == H and wq.shape == (H, H)
    assert wk.shape == (H, L) and wv.shape == (H, L)

    M = B * S
    x2 = x.reshape(M, H)

    tm = min(tm, M)
    tn = min(tn, H)
    grid = (pl.cdiv(M, tm), pl.cdiv(H, tn))

    out_struct = jax.ShapeDtypeStruct((M, H), x.dtype)

    # Advisory cost estimate so XLA can schedule surrounding ops around the
    # custom call.
    flops = 2 * M * (H * H + 3 * H * L)
    bytes_accessed = (
        x2.size * x2.dtype.itemsize
        + wq.size * wq.dtype.itemsize
        + wkv.size * wkv.dtype.itemsize
        + wk.size * wk.dtype.itemsize
        + wv.size * wv.dtype.itemsize
        + 3 * M * H * x.dtype.itemsize)
    cost = pl.CostEstimate(flops=int(flops), transcendentals=0,
                           bytes_accessed=int(bytes_accessed))

    def build(single_buffer_wkv):
        if single_buffer_wkv:
            # Wkv is grid-invariant (constant index map): one buffer suffices.
            wkv_spec = pl.BlockSpec((L, H), lambda i, j: (0, 0),
                                    pipeline_mode=pl.Buffered(1))
        else:
            wkv_spec = pl.BlockSpec((L, H), lambda i, j: (0, 0))

        in_specs = [
            pl.BlockSpec((tm, H), lambda i, j: (i, 0)),   # x rows (j-invariant)
            pl.BlockSpec((tn, H), lambda i, j: (j, 0)),   # Wq column slab
            wkv_spec,                                     # Wkv (resident)
            pl.BlockSpec((tn, L), lambda i, j: (j, 0)),   # Wk column slab
            pl.BlockSpec((tn, L), lambda i, j: (j, 0)),   # Wv column slab
        ]
        out_specs = (
            pl.BlockSpec((tm, tn), lambda i, j: (i, j)),  # query
            pl.BlockSpec((tm, tn), lambda i, j: (i, j)),  # key
            pl.BlockSpec((tm, tn), lambda i, j: (i, j)),  # value
        )
        return pl.pallas_call(
            _fctk_proj_kernel,
            out_shape=(out_struct, out_struct, out_struct),
            grid=grid,
            in_specs=in_specs,
            out_specs=out_specs,
            scratch_shapes=[pltpu.VMEM((tm, L), jnp.float32)],
            compiler_params=pltpu.CompilerParams(
                dimension_semantics=("parallel", "arbitrary"),
                vmem_limit_bytes=int(vmem_limit_bytes)),
            cost_estimate=cost,
        )

    try:
        q2, k2, v2 = build(True)(x2, wq, wkv, wk, wv)
    except Exception:
        # This Pallas build rejected single-buffering; fall back to the
        # default double-buffered (still correct) plan.
        q2, k2, v2 = build(False)(x2, wq, wkv, wk, wv)

    return (q2.reshape(B, S, H),
            k2.reshape(B, S, H),
            v2.reshape(B, S, H))


def _torch_linear_init(key, out_features, in_features):
    """Deterministic init matching nn.Linear default (kaiming-uniform bound)."""
    bound = 1.0 / jnp.sqrt(jnp.float32(in_features))
    return jax.random.uniform(
        key, (out_features, in_features), jnp.float32, -bound, bound)


if __name__ == "__main__":
    # Small shapes consistent with the module.
    batch_size = 2
    seq_len = 8
    hidden_dim = 32
    kv_latent_dim = 16
    num_heads = 4  # head_dim = 8 (unused by the shown forward path)

    root = jax.random.PRNGKey(0)
    kx, kq, kkv, kk, kv_, ko = jax.random.split(root, 6)

    x = jax.random.normal(kx, (batch_size, seq_len, hidden_dim), jnp.float32)

    # Parameters (torch layout: (out_features, in_features)), used as-is.
    wq = _torch_linear_init(kq, hidden_dim, hidden_dim)        # query_proj
    wkv = _torch_linear_init(kkv, kv_latent_dim, hidden_dim)   # kv_latent_proj
    wk = _torch_linear_init(kk, hidden_dim, kv_latent_dim)     # k_proj
    wv = _torch_linear_init(kv_, hidden_dim, kv_latent_dim)    # v_proj
    _wo = _torch_linear_init(ko, hidden_dim, hidden_dim)       # out_proj: unused

    # --- f32 path (matches the torch reference) ---
    query, key, value = jax.block_until_ready(
        fctk_forward_projections(x, wq, wkv, wk, wv))

    # Pure-JAX reference of the projection chain.
    q_ref = x @ wq.T
    lat_ref = x @ wkv.T
    k_ref = lat_ref @ wk.T
    v_ref = lat_ref @ wv.T
    assert jnp.allclose(query, q_ref, atol=1e-4, rtol=1e-4)
    assert jnp.allclose(key, k_ref, atol=1e-4, rtol=1e-4)
    assert jnp.allclose(value, v_ref, atol=1e-4, rtol=1e-4)

    # --- bf16 operand storage (recommended at realistic H); f32 MXU accum ---
    bf16 = lambda a: a.astype(jnp.bfloat16)
    qb, kb, vb = jax.block_until_ready(
        fctk_forward_projections(bf16(x), bf16(wq), bf16(wkv), bf16(wk), bf16(wv)))
    assert jnp.allclose(qb.astype(jnp.float32), q_ref, atol=5e-2, rtol=5e-2)
    assert jnp.allclose(kb.astype(jnp.float32), k_ref, atol=5e-2, rtol=5e-2)
    assert jnp.allclose(vb.astype(jnp.float32), v_ref, atol=5e-2, rtol=5e-2)

    print("KERNEL_OK")
</pallas_src>

<mosaic_0001>
module attributes {stable_mosaic.version = 11 : i64} {
  func.func @_fctk_proj_kernel(%arg0: i32, %arg1: i32, %arg2: memref<16x32xf32, #tpu.memory_space<vmem>>, %arg3: memref<32x32xf32, #tpu.memory_space<vmem>>, %arg4: memref<16x32xf32, #tpu.memory_space<vmem>>, %arg5: memref<32x16xf32, #tpu.memory_space<vmem>>, %arg6: memref<32x16xf32, #tpu.memory_space<vmem>>, %arg7: memref<16x32xf32, #tpu.memory_space<vmem>>, %arg8: memref<16x32xf32, #tpu.memory_space<vmem>>, %arg9: memref<16x32xf32, #tpu.memory_space<vmem>>, %arg10: memref<16x16xf32, #tpu.memory_space<vmem>>) attributes {dimension_semantics = [#tpu.dimension_semantics<parallel>, #tpu.dimension_semantics<arbitrary>], iteration_bounds = array<i64: 1, 1>, scalar_prefetch = 0 : i64, scratch_operands = 1 : i64, tpu.core_type = #tpu.core_type<tc>, window_params = [{transform_indices = @transform_0, window_bounds = array<i64: 16, 32>}, {transform_indices = @transform_1, window_bounds = array<i64: 32, 32>}, {pipeline_mode = #tpu.pipeline_mode<synchronous>, transform_indices = @transform_2, window_bounds = array<i64: 16, 32>}, {transform_indices = @transform_3, window_bounds = array<i64: 32, 16>}, {transform_indices = @transform_4, window_bounds = array<i64: 32, 16>}, {transform_indices = @transform_5, window_bounds = array<i64: 16, 32>}, {transform_indices = @transform_6, window_bounds = array<i64: 16, 32>}, {transform_indices = @transform_7, window_bounds = array<i64: 16, 32>}]} {
    %c0 = arith.constant 0 : index
    %c0_0 = arith.constant 0 : index
    %0 = vector.load %arg2[%c0, %c0_0] : memref<16x32xf32, #tpu.memory_space<vmem>>, vector<16x32xf32>
    %c0_i32 = arith.constant 0 : i32
    %1 = arith.cmpi eq, %arg1, %c0_i32 : i32
    %2 = arith.extui %1 : i1 to i32
    %c0_i32_1 = arith.constant 0 : i32
    %3 = arith.cmpi ne, %2, %c0_i32_1 : i32
    scf.if %3 {
      %c0_18 = arith.constant 0 : index
      %c0_19 = arith.constant 0 : index
      %14 = vector.load %arg4[%c0_18, %c0_19] : memref<16x32xf32, #tpu.memory_space<vmem>>, vector<16x32xf32>
      %cst_20 = arith.constant dense<0.000000e+00> : vector<16x16xf32>
      %15 = tpu.matmul %0, %14, %cst_20 {dimension_numbers = #tpu.dot_dimension_numbers<[1], [1], [0], [0], [0, 0, 1, 0], [], []>} : vector<16x32xf32>, vector<16x32xf32>, vector<16x16xf32> -> vector<16x16xf32>
      %c0_21 = arith.constant 0 : index
      %c0_22 = arith.constant 0 : index
      %16 = vector.load %arg10[%c0_21, %c0_22] : memref<16x16xf32, #tpu.memory_space<vmem>>, vector<16x16xf32>
      tpu.vector_store %arg10[%c0_21, %c0_22], %15 {strides = array<i32>} : memref<16x16xf32, #tpu.memory_space<vmem>>, vector<16x16xf32>,
    } else {
    }
    %c0_2 = arith.constant 0 : index
    %c0_3 = arith.constant 0 : index
    %4 = vector.load %arg3[%c0_2, %c0_3] : memref<32x32xf32, #tpu.memory_space<vmem>>, vector<32x32xf32>
    %cst = arith.constant dense<0.000000e+00> : vector<16x32xf32>
    %5 = tpu.matmul %0, %4, %cst {dimension_numbers = #tpu.dot_dimension_numbers<[1], [1], [0], [0], [0, 0, 1, 0], [], []>} : vector<16x32xf32>, vector<32x32xf32>, vector<16x32xf32> -> vector<16x32xf32>
    %c0_4 = arith.constant 0 : index
    %c0_5 = arith.constant 0 : index
    %6 = vector.load %arg7[%c0_4, %c0_5] : memref<16x32xf32, #tpu.memory_space<vmem>>, vector<16x32xf32>
    tpu.vector_store %arg7[%c0_4, %c0_5], %5 {strides = array<i32>} : memref<16x32xf32, #tpu.memory_space<vmem>>, vector<16x32xf32>,
    %c0_6 = arith.constant 0 : index
    %c0_7 = arith.constant 0 : index
    %7 = vector.load %arg10[%c0_6, %c0_7] : memref<16x16xf32, #tpu.memory_space<vmem>>, vector<16x16xf32>
    %c0_8 = arith.constant 0 : index
    %c0_9 = arith.constant 0 : index
    %8 = vector.load %arg5[%c0_8, %c0_9] : memref<32x16xf32, #tpu.memory_space<vmem>>, vector<32x16xf32>
    %cst_10 = arith.constant dense<0.000000e+00> : vector<16x32xf32>
    %9 = tpu.matmul %7, %8, %cst_10 {dimension_numbers = #tpu.dot_dimension_numbers<[1], [1], [0], [0], [0, 0, 1, 0], [], []>} : vector<16x16xf32>, vector<32x16xf32>, vector<16x32xf32> -> vector<16x32xf32>
    %c0_11 = arith.constant 0 : index
    %c0_12 = arith.constant 0 : index
    %10 = vector.load %arg8[%c0_11, %c0_12] : memref<16x32xf32, #tpu.memory_space<vmem>>, vector<16x32xf32>
    tpu.vector_store %arg8[%c0_11, %c0_12], %9 {strides = array<i32>} : memref<16x32xf32, #tpu.memory_space<vmem>>, vector<16x32xf32>,
    %c0_13 = arith.constant 0 : index
    %c0_14 = arith.constant 0 : index
    %11 = vector.load %arg6[%c0_13, %c0_14] : memref<32x16xf32, #tpu.memory_space<vmem>>, vector<32x16xf32>
    %cst_15 = arith.constant dense<0.000000e+00> : vector<16x32xf32>
    %12 = tpu.matmul %7, %11, %cst_15 {dimension_numbers = #tpu.dot_dimension_numbers<[1], [1], [0], [0], [0, 0, 1, 0], [], []>} : vector<16x16xf32>, vector<32x16xf32>, vector<16x32xf32> -> vector<16x32xf32>
    %c0_16 = arith.constant 0 : index
    %c0_17 = arith.constant 0 : index
    %13 = vector.load %arg9[%c0_16, %c0_17] : memref<16x32xf32, #tpu.memory_space<vmem>>, vector<16x32xf32>
    tpu.vector_store %arg9[%c0_16, %c0_17], %12 {strides = array<i32>} : memref<16x32xf32, #tpu.memory_space<vmem>>, vector<16x32xf32>,
    return
  }
  func.func @transform_0(%arg0: i32, %arg1: i32) -> (i32, i32) {
    %c0_i32 = arith.constant 0 : i32
    %c0_i32_0 = arith.constant 0 : i32
    return %arg0, %c0_i32 : i32, i32
  }
  func.func @transform_1(%arg0: i32, %arg1: i32) -> (i32, i32) {
    %c0_i32 = arith.constant 0 : i32
    %c0_i32_0 = arith.constant 0 : i32
    return %arg1, %c0_i32 : i32, i32
  }
  func.func @transform_2(%arg0: i32, %arg1: i32) -> (i32, i32) {
    %c0_i32 = arith.constant 0 : i32
    %c0_i32_0 = arith.constant 0 : i32
    %c0_i32_1 = arith.constant 0 : i32
    return %c0_i32, %c0_i32_0 : i32, i32
  }
  func.func @transform_3(%arg0: i32, %arg1: i32) -> (i32, i32) {
    %c0_i32 = arith.constant 0 : i32
    %c0_i32_0 = arith.constant 0 : i32
    return %arg1, %c0_i32 : i32, i32
  }
  func.func @transform_4(%arg0: i32, %arg1: i32) -> (i32, i32) {
    %c0_i32 = arith.constant 0 : i32
    %c0_i32_0 = arith.constant 0 : i32
    return %arg1, %c0_i32 : i32, i32
  }
  func.func @transform_5(%arg0: i32, %arg1: i32) -> (i32, i32) {
    %c0_i32 = arith.constant 0 : i32
    return %arg0, %arg1 : i32, i32
  }
  func.func @transform_6(%arg0: i32, %arg1: i32) -> (i32, i32) {
    %c0_i32 = arith.constant 0 : i32
    return %arg0, %arg1 : i32, i32
  }
  func.func @transform_7(%arg0: i32, %arg1: i32) -> (i32, i32) {
    %c0_i32 = arith.constant 0 : i32
    return %arg0, %arg1 : i32, i32
  }
}

module attributes {stable_mosaic.version = 11 : i64} {
  func.func @_fctk_proj_kernel(%arg0: i32, %arg1: i32, %arg2: memref<16x32xf32, #tpu.memory_space<vmem>>, %arg3: memref<32x32xf32, #tpu.memory_space<vmem>>, %arg4: memref<16x32xf32, #tpu.memory_space<vmem>>, %arg5: memref<32x16xf32, #tpu.memory_space<vmem>>, %arg6: memref<32x16xf32, #tpu.memory_space<vmem>>, %arg7: memref<16x32xf32, #tpu.memory_space<vmem>>, %arg8: memref<16x32xf32, #tpu.memory_space<vmem>>, %arg9: memref<16x32xf32, #tpu.memory_space<vmem>>, %arg10: memref<16x16xf32, #tpu.memory_space<vmem>>) attributes {dimension_semantics = [#tpu.dimension_semantics<parallel>, #tpu.dimension_semantics<arbitrary>], iteration_bounds = array<i64: 1, 1>, scalar_prefetch = 0 : i64, scratch_operands = 1 : i64, tpu.core_type = #tpu.core_type<tc>, window_params = [{transform_indices = @transform_0, window_bounds = array<i64: 16, 32>}, {transform_indices = @transform_1, window_bounds = array<i64: 32, 32>}, {pipeline_mode = #tpu.pipeline_mode<synchronous>, transform_indices = @transform_2, window_bounds = array<i64: 16, 32>}, {transform_indices = @transform_3, window_bounds = array<i64: 32, 16>}, {transform_indices = @transform_4, window_bounds = array<i64: 32, 16>}, {transform_indices = @transform_5, window_bounds = array<i64: 16, 32>}, {transform_indices = @transform_6, window_bounds = array<i64: 16, 32>}, {transform_indices = @transform_7, window_bounds = array<i64: 16, 32>}]} {
    %c0 = arith.constant 0 : index
    %c0_0 = arith.constant 0 : index
    %0 = vector.load %arg2[%c0, %c0_0] : memref<16x32xf32, #tpu.memory_space<vmem>>, vector<16x32xf32>
    %c0_i32 = arith.constant 0 : i32
    %1 = arith.cmpi eq, %arg1, %c0_i32 : i32
    %2 = arith.extui %1 : i1 to i32
    %c0_i32_1 = arith.constant 0 : i32
    %3 = arith.cmpi ne, %2, %c0_i32_1 : i32
    scf.if %3 {
      %c0_18 = arith.constant 0 : index
      %c0_19 = arith.constant 0 : index
      %14 = vector.load %arg4[%c0_18, %c0_19] : memref<16x32xf32, #tpu.memory_space<vmem>>, vector<16x32xf32>
      %cst_20 = arith.constant dense<0.000000e+00> : vector<16x16xf32>
      %15 = tpu.matmul %0, %14, %cst_20 {dimension_numbers = #tpu.dot_dimension_numbers<[1], [1], [0], [0], [0, 0, 1, 0], [], []>} : vector<16x32xf32>, vector<16x32xf32>, vector<16x16xf32> -> vector<16x16xf32>
      %c0_21 = arith.constant 0 : index
      %c0_22 = arith.constant 0 : index
      %16 = vector.load %arg10[%c0_21, %c0_22] : memref<16x16xf32, #tpu.memory_space<vmem>>, vector<16x16xf32>
      tpu.vector_store %arg10[%c0_21, %c0_22], %15 {strides = array<i32>} : memref<16x16xf32, #tpu.memory_space<vmem>>, vector<16x16xf32>,
    } else {
    }
    %c0_2 = arith.constant 0 : index
    %c0_3 = arith.constant 0 : index
    %4 = vector.load %arg3[%c0_2, %c0_3] : memref<32x32xf32, #tpu.memory_space<vmem>>, vector<32x32xf32>
    %cst = arith.constant dense<0.000000e+00> : vector<16x32xf32>
    %5 = tpu.matmul %0, %4, %cst {dimension_numbers = #tpu.dot_dimension_numbers<[1], [1], [0], [0], [0, 0, 1, 0], [], []>} : vector<16x32xf32>, vector<32x32xf32>, vector<16x32xf32> -> vector<16x32xf32>
    %c0_4 = arith.constant 0 : index
    %c0_5 = arith.constant 0 : index
    %6 = vector.load %arg7[%c0_4, %c0_5] : memref<16x32xf32, #tpu.memory_space<vmem>>, vector<16x32xf32>
    tpu.vector_store %arg7[%c0_4, %c0_5], %5 {strides = array<i32>} : memref<16x32xf32, #tpu.memory_space<vmem>>, vector<16x32xf32>,
    %c0_6 = arith.constant 0 : index
    %c0_7 = arith.constant 0 : index
    %7 = vector.load %arg10[%c0_6, %c0_7] : memref<16x16xf32, #tpu.memory_space<vmem>>, vector<16x16xf32>
    %c0_8 = arith.constant 0 : index
    %c0_9 = arith.constant 0 : index
    %8 = vector.load %arg5[%c0_8, %c0_9] : memref<32x16xf32, #tpu.memory_space<vmem>>, vector<32x16xf32>
    %cst_10 = arith.constant dense<0.000000e+00> : vector<16x32xf32>
    %9 = tpu.matmul %7, %8, %cst_10 {dimension_numbers = #tpu.dot_dimension_numbers<[1], [1], [0], [0], [0, 0, 1, 0], [], []>} : vector<16x16xf32>, vector<32x16xf32>, vector<16x32xf32> -> vector<16x32xf32>
    %c0_11 = arith.constant 0 : index
    %c0_12 = arith.constant 0 : index
    %10 = vector.load %arg8[%c0_11, %c0_12] : memref<16x32xf32, #tpu.memory_space<vmem>>, vector<16x32xf32>
    tpu.vector_store %arg8[%c0_11, %c0_12], %9 {strides = array<i32>} : memref<16x32xf32, #tpu.memory_space<vmem>>, vector<16x32xf32>,
    %c0_13 = arith.constant 0 : index
    %c0_14 = arith.constant 0 : index
    %11 = vector.load %arg6[%c0_13, %c0_14] : memref<32x16xf32, #tpu.memory_space<vmem>>, vector<32x16xf32>
    %cst_15 = arith.constant dense<0.000000e+00> : vector<16x32xf32>
    %12 = tpu.matmul %7, %11, %cst_15 {dimension_numbers = #tpu.dot_dimension_numbers<[1], [1], [0], [0], [0, 0, 1, 0], [], []>} : vector<16x16xf32>, vector<32x16xf32>, vector<16x32xf32> -> vector<16x32xf32>
    %c0_16 = arith.constant 0 : index
    %c0_17 = arith.constant 0 : index
    %13 = vector.load %arg9[%c0_16, %c0_17] : memref<16x32xf32, #tpu.memory_space<vmem>>, vector<16x32xf32>
    tpu.vector_store %arg9[%c0_16, %c0_17], %12 {strides = array<i32>} : memref<16x32xf32, #tpu.memory_space<vmem>>, vector<16x32xf32>,
    return
  }
  func.func @transform_0(%arg0: i32, %arg1: i32) -> (i32, i32) {
    %c0_i32 = arith.constant 0 : i32
    %c0_i32_0 = arith.constant 0 : i32
    return %arg0, %c0_i32 : i32, i32
  }
  func.func @transform_1(%arg0: i32, %arg1: i32) -> (i32, i32) {
    %c0_i32 = arith.constant 0 : i32
    %c0_i32_0 = arith.constant 0 : i32
    return %arg1, %c0_i32 : i32, i32
  }
  func.func @transform_2(%arg0: i32, %arg1: i32) -> (i32, i32) {
    %c0_i32 = arith.constant 0 : i32
    %c0_i32_0 = arith.constant 0 : i32
    %c0_i32_1 = arith.constant 0 : i32
    return %c0_i32, %c0_i32_0 : i32, i32
  }
  func.func @transform_3(%arg0: i32, %arg1: i32) -> (i32, i32) {
    %c0_i32 = arith.constant 0 : i32
    %c0_i32_0 = arith.constant 0 : i32
    return %arg1, %c0_i32 : i32, i32
  }
  func.func @transform_4(%arg0: i32, %arg1: i32) -> (i32, i32) {
    %c0_i32 = arith.constant 0 : i32
    %c0_i32_0 = arith.constant 0 : i32
    return %arg1, %c0_i32 : i32, i32
  }
  func.func @transform_5(%arg0: i32, %arg1: i32) -> (i32, i32) {
    %c0_i32 = arith.constant 0 : i32
    return %arg0, %arg1 : i32, i32
  }
  func.func @transform_6(%arg0: i32, %arg1: i32) -> (i32, i32) {
    %c0_i32 = arith.constant 0 : i32
    return %arg0, %arg1 : i32, i32
  }
  func.func @transform_7(%arg0: i32, %arg1: i32) -> (i32, i32) {
    %c0_i32 = arith.constant 0 : i32
    return %arg0, %arg1 : i32, i32
  }
}

</mosaic_0001>

<bundles_post_ra>
// kernel: tpu_custom_call.1
= control target key start
LH: loop header
LB: loop body
LE: loop exit
PB: predicated region body
PF: predicated region fallthrough
CT: control target
= control target key end

     0   :  { %13 = vsyncpa [#allocation4], 0  ;;  %vm33_vm0 = vcmask 261120   ;;  %s774_s0 = inlined_call_operand.vmem [shape: f32[16,32], index: 0, kind: input, shape index: {}]   ;;  %s775_s1 = inlined_call_operand.vmem [shape: f32[32,32], index: 1, kind: input, shape index: {}]   ;;  %s776_s2 = inlined_call_operand.vmem [shape: f32[16,32], index: 2, kind: input, shape index: {}]   ;;  %s777_s3 = inlined_call_operand.vmem [shape: f32[32,16], index: 3, kind: input, shape index: {}]   ;;  %s778_s4 = inlined_call_operand.vmem [shape: f32[32,16], index: 4, kind: input, shape index: {}]   ;;  %s779_s5 = inlined_call_operand.hbm [shape: f32[16,32], index: 5, kind: output, shape index: {0}]   ;;  %s780_s6 = inlined_call_operand.hbm [shape: f32[16,32], index: 6, kind: output, shape index: {1}]   ;;  %s781_s7 = inlined_call_operand.hbm [shape: f32[16,32], index: 7, kind: output, shape index: {2}]  }
   0x1   :  { %v32_v0 = vld [vmem:[%s776_s2 + $0x8] sm:$0xff]  ;;  %v31_v1 = vld [vmem:[%s776_s2] sm:$0xff]  ;;  %v127_v3 = vld [vmem:[%s775_s1 + $0x18] sm:$0xff] }
   0x2   :  { %v25_v2 = vld [vmem:[%s774_s0] sm:$0xff]  ;;  %510 = vmatprep.subr.msk.mxu0 %vm33_vm0, %v32_v0  ;;  %v126_v4 = vld [vmem:[%s775_s1 + $0x10] sm:$0xff]  ;;  %517 = vmatprep.subr.msk.mxu1 %vm33_vm0, %v127_v3 }
   0x3   :  { %514 = vmatprep.mubr.msk.f32.mxu0 %vm33_vm0, %v25_v2  ;;  %511 = vmatpush3.xpose.msk.msra.mxu0 %vm33_vm0, %v32_v0 }
   0x4   :  { %512 = vmatprep.subr.msk.mxu0 %vm33_vm0, %v31_v1  ;;  %518 = vmatpush3.xpose.msk.msra.mxu1 %vm33_vm0, %v127_v3 }
   0x5   :  { %14 = vsyncpa [#allocation6], 0  ;;  %519 = vmatprep.subr.msk.mxu1 %vm33_vm0, %v126_v4  ;;  %525 = vmatprep.mubr.msk.f32.mxu1 %vm33_vm0, %v25_v2  ;;  %vm121_vm1 = vcmask 130048   ;;  %v229_v5 = vld [vmem:[%s777_s3 + $0x18] sm:$0xff]  ;;  %v125_v6 = vld [vmem:[%s775_s1 + $0x8] sm:$0xff] }
   0x6   :  { %v26_v7 = vld [vmem:[%s774_s0 + $0x8] sm:$0xff]  ;;  %v124_v8 = vld [vmem:[%s775_s1] sm:$0xff]  ;;  %v329_v9 = vld [vmem:[%s778_s4 + $0x18] sm:$0xff] }
   0x7   :  { %513 = vmatpush3.xpose.msk.msra.mxu0 %vm33_vm0, %v31_v1  ;;  %v228_v10 = vld [vmem:[%s777_s3 + $0x10] sm:$0xff]  ;;  %v227_v12 = vld [vmem:[%s777_s3 + $0x8] sm:$0xff]  ;;  %v226_v14 = vld [vmem:[%s777_s3] sm:$0xff]  ;;  %s619_s3 = smov [#allocation3]  }
   0x8   :  { %520 = vmatpush3.xpose.msk.msra.mxu1 %vm33_vm0, %v126_v4  ;;  %528 = vmatprep.subr.msk.mxu0 %vm121_vm1, %v229_v5  ;;  %v328_v11 = vld [vmem:[%s778_s4 + $0x10] sm:$0xff]  ;;  %v327_v13 = vld [vmem:[%s778_s4 + $0x8] sm:$0xff]  ;;  %v326_v15 = vld [vmem:[%s778_s4] sm:$0xff]  ;;  %s424_s4 = sshll.u32 %s619_s3, 4  ;;  %s425_s4 = int_to_ptr.vmem [resolvable:$true] %s424_s4 }
   0x9   :  { %521 = vmatprep.subr.msk.mxu1 %vm33_vm0, %v125_v6  ;;  %s555_s30 = scalar_lea.vmem %s425_s4, 256  ;;  %p560_p1 = scmp.lt.s32.totalorder %s425_s4, %s425_s4 }
   0xa   :  { %515 = vmatmul.mubr.msk.f32.vlgmr.msra.gmra.mxu0 %vm33_vm0, %v26_v7  ;;  %p556_p0 = scmp.ne.s32.totalorder %s425_s4, %s555_s30  ;;  %p561_p2 = scmp.lt.s32.totalorder %s555_s30, %s555_s30 }
   0xb   :  { %529 = vmatpush3.xpose.msk.msra.mxu0 %vm121_vm1, %v229_v5 }
   0xc   :  { %522 = vmatpush3.xpose.msk.msra.mxu1 %vm33_vm0, %v125_v6  ;;  %530 = vmatprep.subr.msk.mxu0 %vm121_vm1, %v228_v10  ;;  %p562_p3 = por %p561_p2, %p560_p1 }
   0xd   :  { %523 = vmatprep.subr.msk.mxu1 %vm33_vm0, %v124_v8 }
   0xe   :  { %p563_p4 = pnand %p562_p3, %p556_p0 }
   0xf   :  { %531 = vmatpush3.xpose.msk.msra.mxu0 %vm121_vm1, %v228_v10 }
  0x10   :  { %524 = vmatpush3.xpose.msk.msra.mxu1 %vm33_vm0, %v124_v8  ;;  %532 = vmatprep.subr.msk.mxu0 %vm121_vm1, %v227_v12 }
  0x11   :  { %539 = vmatprep.subr.msk.mxu1 %vm121_vm1, %v329_v9 }
  0x13   :  { %526 = vmatmul.mubr.msk.f32.vlgmr.msra.gmra.mxu1 %vm33_vm0, %v26_v7  ;;  %533 = vmatpush3.xpose.msk.msra.mxu0 %vm121_vm1, %v227_v12 }
  0x14   :  { %540 = vmatpush3.xpose.msk.msra.mxu1 %vm121_vm1, %v329_v9  ;;  %534 = vmatprep.subr.msk.mxu0 %vm121_vm1, %v226_v14 }
  0x15   :  { %541 = vmatprep.subr.msk.mxu1 %vm121_vm1, %v328_v11 }
  0x17   :  { %535 = vmatpush3.xpose.msk.msra.mxu0 %vm121_vm1, %v226_v14 }
  0x18   :  { %542 = vmatpush3.xpose.msk.msra.mxu1 %vm121_vm1, %v328_v11 }
  0x19   :  { %543 = vmatprep.subr.msk.mxu1 %vm121_vm1, %v327_v13 }
  0x1c   :  { %544 = vmatpush3.xpose.msk.msra.mxu1 %vm121_vm1, %v327_v13 }
  0x1d   :  { %545 = vmatprep.subr.msk.mxu1 %vm121_vm1, %v326_v15 }
  0x20   :  { %546 = vmatpush3.xpose.msk.msra.mxu1 %vm121_vm1, %v326_v15 }
  0xca   :  { %v516_v16 = vpop.f32.mrf.mxu0 }
  0xcb   :  { %123 = vst.msk [vmem:[#allocation2 + $0x8] sm:$0xff] %vm121_vm1, %v516_v16 }
  0xcc   :  { %v112_v17 = vpop.f32.mrf.mxu0 }
  0xcd   :  { %122 = vst.msk [vmem:[#allocation2] sm:$0xff] %vm121_vm1, %v112_v17 }
  0xd2   :  { %v225_v20 = vld [vmem:[#allocation2 + $0x8] sm:$0xff] }
  0xd3   :  { %v527_v18 = vpop.f32.mrf.mxu1 }
  0xd4   :  { %v224_v19 = vld [vmem:[#allocation2] sm:$0xff]  ;;  %223 = vst.msk [vmem:[#allocation3 + $0x8] sm:$0xff] %vm33_vm0, %v527_v18 }
  0xd5   :  { %536 = vmatprep.mubr.msk.f32.mxu0 %vm121_vm1, %v224_v19  ;;  %547 = vmatprep.mubr.msk.f32.mxu1 %vm121_vm1, %v224_v19  ;;  %v213_v21 = vpop.f32.mrf.mxu1 }
  0xd6   :  { %537 = vmatmul.mubr.msk.f32.vlgmr.msra.gmra.mxu0 %vm121_vm1, %v225_v20  ;;  %548 = vmatmul.mubr.msk.f32.vlgmr.msra.gmra.mxu1 %vm121_vm1, %v225_v20  ;;  %222 = vst.msk [vmem:[#allocation3] sm:$0xff] %vm33_vm0, %v213_v21 }
  0xd7   :  { %566 = shalt.err (!%p563_p4)
}
  0xd8   :  { %s620_s8 = smov 128   ;;  %s621_s9 = smov 8  }
  0xd9   :  { %430 = dma.vmem_to_hbm [thread:$0]  %s425_s4, 256, %s779_s5, [#allocation4], %s620_s8, %s620_s8, %s621_s9  }
  0xda   :  { %s622_s11 = smov [#allocation5]   ;;  %s623_s13 = smov [#allocation7]  }
  0xdb   :  { %s436_s12 = sshll.u32 %s622_s11, 4  ;;  %s448_s14 = sshll.u32 %s623_s13, 4  ;;  %s437_s12 = int_to_ptr.vmem [resolvable:$true] %s436_s12  ;;  %s449_s14 = int_to_ptr.vmem [resolvable:$true] %s448_s14 }
  0xdc   :  { %s575_s15 = scalar_lea.vmem %s437_s12, 256  ;;  %p580_p6 = scmp.lt.s32.totalorder %s437_s12, %s437_s12 }
  0xdd   :  { %p576_p5 = scmp.ne.s32.totalorder %s437_s12, %s575_s15  ;;  %p581_p7 = scmp.lt.s32.totalorder %s575_s15, %s575_s15 }
  0xdf   :  { %p582_p8 = por %p581_p7, %p580_p6 }
  0xe1   :  { %p583_p9 = pnand %p582_p8, %p576_p5 }
 0x196   :  { %v538_v22 = vpop.f32.mrf.mxu0  ;;  %v549_v23 = vpop.f32.mrf.mxu1 }
 0x197   :  { %325 = vst.msk [vmem:[#allocation5 + $0x8] sm:$0xff] %vm33_vm0, %v538_v22  ;;  %418 = vst.msk [vmem:[#allocation7 + $0x8] sm:$0xff] %vm33_vm0, %v549_v23 }
 0x198   :  { %v315_v24 = vpop.f32.mrf.mxu0  ;;  %v408_v25 = vpop.f32.mrf.mxu1 }
 0x199   :  { %324 = vst.msk [vmem:[#allocation5] sm:$0xff] %vm33_vm0, %v315_v24  ;;  %417 = vst.msk [vmem:[#allocation7] sm:$0xff] %vm33_vm0, %v408_v25 }
 0x19a   :  { %586 = shalt.err (!%p583_p9)
}
 0x19b   :  { %442 = dma.vmem_to_hbm [thread:$0]  %s437_s12, 256, %s780_s6, [#allocation6], %s620_s8, %s620_s8, %s621_s9  }
 0x19c   :  { %s595_s17 = scalar_lea.vmem %s449_s14, 256  ;;  %p600_p11 = scmp.lt.s32.totalorder %s449_s14, %s449_s14 }
 0x19d   :  { %p596_p10 = scmp.ne.s32.totalorder %s449_s14, %s595_s17  ;;  %p601_p12 = scmp.lt.s32.totalorder %s595_s17, %s595_s17 }
 0x19f   :  { %p602_p13 = por %p601_p12, %p600_p11 }
 0x1a1   :  { %p603_p0 = pnand %p602_p13, %p596_p10 }
 0x1a3   :  { %606 = shalt.err (!%p603_p0)
}
 0x1a4   :  { %454 = dma.vmem_to_hbm [thread:$0]  %s449_s14, 256, %s781_s7, [#allocation6], %s620_s8, %s620_s8, %s621_s9  }
 0x1a5   :  { %615 = dma.done.wait [#allocation4], 256  }
 0x1a6   :  { %616 = vsyncadd [#allocation4], 4294967040 }
 0x1a7   :  { %617 = dma.done.wait [#allocation6], 512  }
 0x1a8   :  { %618 = vsyncadd [#allocation6], 4294966784 }
 0x1a9   :  { %464 = vsyncpa [#allocation4], 1 }
 0x1aa   :  { %465 = vsyncpa [#allocation6], 1 }

// kernel: tpu_custom_call.1
= control target key start
LH: loop header
LB: loop body
LE: loop exit
PB: predicated region body
PF: predicated region fallthrough
CT: control target
= control target key end

     0   :  { %13 = vsyncpa [#allocation4], 0  ;;  %vm33_vm0 = vcmask 261120   ;;  %s774_s0 = inlined_call_operand.vmem [shape: f32[16,32], index: 0, kind: input, shape index: {}]   ;;  %s775_s1 = inlined_call_operand.vmem [shape: f32[32,32], index: 1, kind: input, shape index: {}]   ;;  %s776_s2 = inlined_call_operand.vmem [shape: f32[16,32], index: 2, kind: input, shape index: {}]   ;;  %s777_s3 = inlined_call_operand.vmem [shape: f32[32,16], index: 3, kind: input, shape index: {}]   ;;  %s778_s4 = inlined_call_operand.vmem [shape: f32[32,16], index: 4, kind: input, shape index: {}]   ;;  %s779_s5 = inlined_call_operand.hbm [shape: f32[16,32], index: 5, kind: output, shape index: {0}]   ;;  %s780_s6 = inlined_call_operand.hbm [shape: f32[16,32], index: 6, kind: output, shape index: {1}]   ;;  %s781_s7 = inlined_call_operand.hbm [shape: f32[16,32], index: 7, kind: output, shape index: {2}]  }
   0x1   :  { %v32_v0 = vld [vmem:[%s776_s2 + $0x8] sm:$0xff]  ;;  %v31_v1 = vld [vmem:[%s776_s2] sm:$0xff]  ;;  %v127_v3 = vld [vmem:[%s775_s1 + $0x18] sm:$0xff] }
   0x2   :  { %v25_v2 = vld [vmem:[%s774_s0] sm:$0xff]  ;;  %510 = vmatprep.subr.msk.mxu0 %vm33_vm0, %v32_v0  ;;  %v126_v4 = vld [vmem:[%s775_s1 + $0x10] sm:$0xff]  ;;  %517 = vmatprep.subr.msk.mxu1 %vm33_vm0, %v127_v3 }
   0x3   :  { %514 = vmatprep.mubr.msk.f32.mxu0 %vm33_vm0, %v25_v2  ;;  %511 = vmatpush3.xpose.msk.msra.mxu0 %vm33_vm0, %v32_v0 }
   0x4   :  { %512 = vmatprep.subr.msk.mxu0 %vm33_vm0, %v31_v1  ;;  %518 = vmatpush3.xpose.msk.msra.mxu1 %vm33_vm0, %v127_v3 }
   0x5   :  { %14 = vsyncpa [#allocation6], 0  ;;  %519 = vmatprep.subr.msk.mxu1 %vm33_vm0, %v126_v4  ;;  %525 = vmatprep.mubr.msk.f32.mxu1 %vm33_vm0, %v25_v2  ;;  %vm121_vm1 = vcmask 130048   ;;  %v229_v5 = vld [vmem:[%s777_s3 + $0x18] sm:$0xff]  ;;  %v125_v6 = vld [vmem:[%s775_s1 + $0x8] sm:$0xff] }
   0x6   :  { %v26_v7 = vld [vmem:[%s774_s0 + $0x8] sm:$0xff]  ;;  %v124_v8 = vld [vmem:[%s775_s1] sm:$0xff]  ;;  %v329_v9 = vld [vmem:[%s778_s4 + $0x18] sm:$0xff] }
   0x7   :  { %513 = vmatpush3.xpose.msk.msra.mxu0 %vm33_vm0, %v31_v1  ;;  %v228_v10 = vld [vmem:[%s777_s3 + $0x10] sm:$0xff]  ;;  %v227_v12 = vld [vmem:[%s777_s3 + $0x8] sm:$0xff]  ;;  %v226_v14 = vld [vmem:[%s777_s3] sm:$0xff]  ;;  %s619_s3 = smov [#allocation3]  }
   0x8   :  { %520 = vmatpush3.xpose.msk.msra.mxu1 %vm33_vm0, %v126_v4  ;;  %528 = vmatprep.subr.msk.mxu0 %vm121_vm1, %v229_v5  ;;  %v328_v11 = vld [vmem:[%s778_s4 + $0x10] sm:$0xff]  ;;  %v327_v13 = vld [vmem:[%s778_s4 + $0x8] sm:$0xff]  ;;  %v326_v15 = vld [vmem:[%s778_s4] sm:$0xff]  ;;  %s424_s4 = sshll.u32 %s619_s3, 4  ;;  %s425_s4 = int_to_ptr.vmem [resolvable:$true] %s424_s4 }
   0x9   :  { %521 = vmatprep.subr.msk.mxu1 %vm33_vm0, %v125_v6  ;;  %s555_s30 = scalar_lea.vmem %s425_s4, 256  ;;  %p560_p1 = scmp.lt.s32.totalorder %s425_s4, %s425_s4 }
   0xa   :  { %515 = vmatmul.mubr.msk.f32.vlgmr.msra.gmra.mxu0 %vm33_vm0, %v26_v7  ;;  %p556_p0 = scmp.ne.s32.totalorder %s425_s4, %s555_s30  ;;  %p561_p2 = scmp.lt.s32.totalorder %s555_s30, %s555_s30 }
   0xb   :  { %529 = vmatpush3.xpose.msk.msra.mxu0 %vm121_vm1, %v229_v5 }
   0xc   :  { %522 = vmatpush3.xpose.msk.msra.mxu1 %vm33_vm0, %v125_v6  ;;  %530 = vmatprep.subr.msk.mxu0 %vm121_vm1, %v228_v10  ;;  %p562_p3 = por %p561_p2, %p560_p1 }
   0xd   :  { %523 = vmatprep.subr.msk.mxu1 %vm33_vm0, %v124_v8 }
   0xe   :  { %p563_p4 = pnand %p562_p3, %p556_p0 }
   0xf   :  { %531 = vmatpush3.xpose.msk.msra.mxu0 %vm121_vm1, %v228_v10 }
  0x10   :  { %524 = vmatpush3.xpose.msk.msra.mxu1 %vm33_vm0, %v124_v8  ;;  %532 = vmatprep.subr.msk.mxu0 %vm121_vm1, %v227_v12 }
  0x11   :  { %539 = vmatprep.subr.msk.mxu1 %vm121_vm1, %v329_v9 }
  0x13   :  { %526 = vmatmul.mubr.msk.f32.vlgmr.msra.gmra.mxu1 %vm33_vm0, %v26_v7  ;;  %533 = vmatpush3.xpose.msk.msra.mxu0 %vm121_vm1, %v227_v12 }
  0x14   :  { %540 = vmatpush3.xpose.msk.msra.mxu1 %vm121_vm1, %v329_v9  ;;  %534 = vmatprep.subr.msk.mxu0 %vm121_vm1, %v226_v14 }
  0x15   :  { %541 = vmatprep.subr.msk.mxu1 %vm121_vm1, %v328_v11 }
  0x17   :  { %535 = vmatpush3.xpose.msk.msra.mxu0 %vm121_vm1, %v226_v14 }
  0x18   :  { %542 = vmatpush3.xpose.msk.msra.mxu1 %vm121_vm1, %v328_v11 }
  0x19   :  { %543 = vmatprep.subr.msk.mxu1 %vm121_vm1, %v327_v13 }
  0x1c   :  { %544 = vmatpush3.xpose.msk.msra.mxu1 %vm121_vm1, %v327_v13 }
  0x1d   :  { %545 = vmatprep.subr.msk.mxu1 %vm121_vm1, %v326_v15 }
  0x20   :  { %546 = vmatpush3.xpose.msk.msra.mxu1 %vm121_vm1, %v326_v15 }
  0xca   :  { %v516_v16 = vpop.f32.mrf.mxu0 }
  0xcb   :  { %123 = vst.msk [vmem:[#allocation2 + $0x8] sm:$0xff] %vm121_vm1, %v516_v16 }
  0xcc   :  { %v112_v17 = vpop.f32.mrf.mxu0 }
  0xcd   :  { %122 = vst.msk [vmem:[#allocation2] sm:$0xff] %vm121_vm1, %v112_v17 }
  0xd2   :  { %v225_v20 = vld [vmem:[#allocation2 + $0x8] sm:$0xff] }
  0xd3   :  { %v527_v18 = vpop.f32.mrf.mxu1 }
  0xd4   :  { %v224_v19 = vld [vmem:[#allocation2] sm:$0xff]  ;;  %223 = vst.msk [vmem:[#allocation3 + $0x8] sm:$0xff] %vm33_vm0, %v527_v18 }
  0xd5   :  { %536 = vmatprep.mubr.msk.f32.mxu0 %vm121_vm1, %v224_v19  ;;  %547 = vmatprep.mubr.msk.f32.mxu1 %vm121_vm1, %v224_v19  ;;  %v213_v21 = vpop.f32.mrf.mxu1 }
  0xd6   :  { %537 = vmatmul.mubr.msk.f32.vlgmr.msra.gmra.mxu0 %vm121_vm1, %v225_v20  ;;  %548 = vmatmul.mubr.msk.f32.vlgmr.msra.gmra.mxu1 %vm121_vm1, %v225_v20  ;;  %222 = vst.msk [vmem:[#allocation3] sm:$0xff] %vm33_vm0, %v213_v21 }
  0xd7   :  { %566 = shalt.err (!%p563_p4)
}
  0xd8   :  { %s620_s8 = smov 128   ;;  %s621_s9 = smov 8  }
  0xd9   :  { %430 = dma.vmem_to_hbm [thread:$0]  %s425_s4, 256, %s779_s5, [#allocation4], %s620_s8, %s620_s8, %s621_s9  }
  0xda   :  { %s622_s11 = smov [#allocation5]   ;;  %s623_s13 = smov [#allocation7]  }
  0xdb   :  { %s436_s12 = sshll.u32 %s622_s11, 4  ;;  %s448_s14 = sshll.u32 %s623_s13, 4  ;;  %s437_s12 = int_to_ptr.vmem [resolvable:$true] %s436_s12  ;;  %s449_s14 = int_to_ptr.vmem [resolvable:$true] %s448_s14 }
  0xdc   :  { %s575_s15 = scalar_lea.vmem %s437_s12, 256  ;;  %p580_p6 = scmp.lt.s32.totalorder %s437_s12, %s437_s12 }
  0xdd   :  { %p576_p5 = scmp.ne.s32.totalorder %s437_s12, %s575_s15  ;;  %p581_p7 = scmp.lt.s32.totalorder %s575_s15, %s575_s15 }
  0xdf   :  { %p582_p8 = por %p581_p7, %p580_p6 }
  0xe1   :  { %p583_p9 = pnand %p582_p8, %p576_p5 }
 0x196   :  { %v538_v22 = vpop.f32.mrf.mxu0  ;;  %v549_v23 = vpop.f32.mrf.mxu1 }
 0x197   :  { %325 = vst.msk [vmem:[#allocation5 + $0x8] sm:$0xff] %vm33_vm0, %v538_v22  ;;  %418 = vst.msk [vmem:[#allocation7 + $0x8] sm:$0xff] %vm33_vm0, %v549_v23 }
 0x198   :  { %v315_v24 = vpop.f32.mrf.mxu0  ;;  %v408_v25 = vpop.f32.mrf.mxu1 }
 0x199   :  { %324 = vst.msk [vmem:[#allocation5] sm:$0xff] %vm33_vm0, %v315_v24  ;;  %417 = vst.msk [vmem:[#allocation7] sm:$0xff] %vm33_vm0, %v408_v25 }
 0x19a   :  { %586 = shalt.err (!%p583_p9)
}
 0x19b   :  { %442 = dma.vmem_to_hbm [thread:$0]  %s437_s12, 256, %s780_s6, [#allocation6], %s620_s8, %s620_s8, %s621_s9  }
 0x19c   :  { %s595_s17 = scalar_lea.vmem %s449_s14, 256  ;;  %p600_p11 = scmp.lt.s32.totalorder %s449_s14, %s449_s14 }
 0x19d   :  { %p596_p10 = scmp.ne.s32.totalorder %s449_s14, %s595_s17  ;;  %p601_p12 = scmp.lt.s32.totalorder %s595_s17, %s595_s17 }
 0x19f   :  { %p602_p13 = por %p601_p12, %p600_p11 }
 0x1a1   :  { %p603_p0 = pnand %p602_p13, %p596_p10 }
 0x1a3   :  { %606 = shalt.err (!%p603_p0)
}
 0x1a4   :  { %454 = dma.vmem_to_hbm [thread:$0]  %s449_s14, 256, %s781_s7, [#allocation6], %s620_s8, %s620_s8, %s621_s9  }
 0x1a5   :  { %615 = dma.done.wait [#allocation4], 256  }
 0x1a6   :  { %616 = vsyncadd [#allocation4], 4294967040 }
 0x1a7   :  { %617 = dma.done.wait [#allocation6], 512  }
 0x1a8   :  { %618 = vsyncadd [#allocation6], 4294966784 }
 0x1a9   :  { %464 = vsyncpa [#allocation4], 1 }
 0x1aa   :  { %465 = vsyncpa [#allocation6], 1 }

</bundles_post_ra>
